<compile_context>
chip_gen: v7x
topology: tpu7x:2x2x1
jax: 0.10.0
libtpu: 0.0.40
codegen_flags: <defaults>
</compile_context>

<pallas_src>
import functools

import jax
import jax.numpy as jnp
from jax.experimental import pallas as pl
from jax.experimental.pallas import tpu as pltpu


def _adain_norm_kernel(x_ref, yc_ref, o_ref):
    """One (TM, HW) row tile: per-row mean/var over the lane axis + affine.

    x_ref : (TM, HW)  input dtype
    yc_ref: (TM, 2)   f32, col 0 = ys (scale), col 1 = yb (bias)
    o_ref : (TM, HW)  input dtype
    """
    x = x_ref[...].astype(jnp.float32)
    ys = yc_ref[:, 0:1]
    yb = yc_ref[:, 1:2]

    inv_hw = 1.0 / x.shape[-1]
    mean = jnp.sum(x, axis=-1, keepdims=True) * inv_hw
    xc = x - mean
    var = jnp.sum(xc * xc, axis=-1, keepdims=True) * inv_hw   # centered 2-pass
    std_rev = jax.lax.rsqrt(var)          # no epsilon — matches torch reference

    # Reference: o = ((x - mean) - std_rev) * ys + yb
    #          = xc * ys + (yb - std_rev * ys)   (fold per-row constants)
    c = yb - std_rev * ys
    o_ref[...] = (xc * ys + c).astype(o_ref.dtype)


_TILE_BUDGET = 4 * 1024 * 1024   # ~HBM-roofline plateau, v7x-safe
_TILE_FLOOR = 1 * 1024 * 1024    # don't shrink below DMA-efficiency floor


def _pick_row_tile(rows, hw, itemsize):
    """Row-tile size (rows on sublanes, HW on lanes).

    ~4 MiB x-tiles (in+out double-buffered ~16 MiB) fit every generation's
    VMEM; also aim for >= ~8 grid steps when rows allow so v7x's second
    TensorCore gets work and the DMA pipeline has depth, without dropping a
    tile below ~1 MiB.
    """
    row_bytes = max(1, hw * itemsize)
    tm_budget = max(8, (_TILE_BUDGET // row_bytes) // 8 * 8)
    tm_floor = max(8, (_TILE_FLOOR // row_bytes) // 8 * 8)
    tm_steps = max(8, (-(-rows // 8) + 7) // 8 * 8)   # ~8 grid steps
    tm = min(tm_budget, max(tm_floor, tm_steps))
    if tm >= rows:
        return int(rows)   # single full-dim block (always a legal block shape)
    return int(tm)         # multiple of 8; ragged last block handled by Pallas


@functools.partial(jax.jit, static_argnames=("norm",))
def adain_forward(x, w, ws, bs, wb, bb, norm=True):
    """AdaIN forward.  x: (B, C_out, H, W), w: (B, C_in).
    ws/wb: (C_in, C_out), bs/bb: (1, C_out)  (torch Linear: y = w @ W + b)."""
    B, C, H, W = x.shape
    HW = H * W
    rows = B * C

    # Tiny affine matmuls hoisted out of the kernel (far below one MXU tile).
    f32 = jnp.float32
    ys = (w.astype(f32) @ ws.astype(f32) + bs.reshape(1, -1).astype(f32))
    yb = (w.astype(f32) @ wb.astype(f32) + bb.reshape(1, -1).astype(f32))
    ys = ys.reshape(rows, 1)
    yb = yb.reshape(rows, 1)
    x2 = x.reshape(rows, HW)               # native dtype, no copy

    if not norm:
        # norm=False is a trivial per-row affine; plain JAX is already optimal.
        out = (x2.astype(f32) * ys + yb).astype(x.dtype)
        return out.reshape(x.shape)

    yc = jnp.concatenate([ys, yb], axis=1)  # (rows, 2) f32 — one DMA per step

    TM = _pick_row_tile(rows, HW, jnp.dtype(x.dtype).itemsize)
    grid = (pl.cdiv(rows, TM),)

    # TODO(synk): for very large HW (one TM=8 tile > ~8 MiB, i.e. HW >~ 256K
    # f32 elements) switch to a 2-axis grid over HW chunks ('arbitrary' axis)
    # with running sum/sumsq accumulation in VMEM scratch so v7x's 64 MiB/TC
    # VMEM budget is respected.

    out = pl.pallas_call(
        _adain_norm_kernel,
        out_shape=jax.ShapeDtypeStruct((rows, HW), x.dtype),
        grid=grid,
        in_specs=[
            pl.BlockSpec((TM, HW), lambda i: (i, 0)),   # x row tile (lane-dense)
            pl.BlockSpec((TM, 2), lambda i: (i, 0)),    # packed per-row ys/yb
        ],
        out_specs=pl.BlockSpec((TM, HW), lambda i: (i, 0)),
        compiler_params=pltpu.CompilerParams(
            dimension_semantics=("parallel",),          # megacore-shard rows
            vmem_limit_bytes=48 * 1024 * 1024,          # v7x-safe (<64 MiB/TC)
        ),
    )(x2, yc)

    return out.reshape(x.shape)


def _reference(x, w, ws, bs, wb, bb, norm=True):
    B, C, H, W = x.shape
    ys = (w @ ws + bs)[:, :, None]
    yb = (w @ wb + bb)[:, :, None]
    xm = x.reshape(B, C, -1)
    if norm:
        xm_mean = jnp.mean(xm, axis=2, keepdims=True)
        xm_centered = xm - xm_mean
        xm_std_rev = jax.lax.rsqrt(
            jnp.mean(xm_centered * xm_centered, axis=2, keepdims=True))
        xm_norm = xm_centered - xm_std_rev
    else:
        xm_norm = xm
    return (xm_norm * ys + yb).reshape(x.shape)


if __name__ == "__main__":
    B, C_in, C_out, Hs, Ws_ = 2, 8, 4, 16, 16

    key = jax.random.PRNGKey(0)
    kx, kw, k1, k2, k3, k4 = jax.random.split(key, 6)

    x = jax.random.normal(kx, (B, C_out, Hs, Ws_), dtype=jnp.float32)
    w = jax.random.normal(kw, (B, C_in), dtype=jnp.float32)

    # synthetic parameters with nn.Linear(C_in, C_out) shapes
    ws = jax.random.normal(k1, (C_in, C_out), dtype=jnp.float32) * 0.1
    bs = jax.random.normal(k2, (1, C_out), dtype=jnp.float32) * 0.1
    wb = jax.random.normal(k3, (C_in, C_out), dtype=jnp.float32) * 0.1
    bb = jax.random.normal(k4, (1, C_out), dtype=jnp.float32) * 0.1

    out = adain_forward(x, w, ws, bs, wb, bb, norm=True)
    out = jax.block_until_ready(out)

    ref = _reference(x, w, ws, bs, wb, bb, norm=True)
    assert out.shape == x.shape
    assert jnp.allclose(out, ref, atol=1e-4, rtol=1e-4)

    out_nonorm = jax.block_until_ready(
        adain_forward(x, w, ws, bs, wb, bb, norm=False))
    ref_nonorm = _reference(x, w, ws, bs, wb, bb, norm=False)
    assert jnp.allclose(out_nonorm, ref_nonorm, atol=1e-4, rtol=1e-4)

    print("KERNEL_OK")
</pallas_src>

<mosaic_0001>
module attributes {stable_mosaic.version = 11 : i64} {
  func.func @_adain_norm_kernel(%arg0: i32, %arg1: memref<8x256xf32, #tpu.memory_space<vmem>>, %arg2: memref<8x2xf32, #tpu.memory_space<vmem>>, %arg3: memref<8x256xf32, #tpu.memory_space<vmem>>) attributes {dimension_semantics = [#tpu.dimension_semantics<parallel>], iteration_bounds = array<i64: 1>, scalar_prefetch = 0 : i64, scratch_operands = 0 : i64, tpu.core_type = #tpu.core_type<tc>, window_params = [{transform_indices = @transform_0, window_bounds = array<i64: 8, 256>}, {transform_indices = @transform_1, window_bounds = array<i64: 8, 2>}, {transform_indices = @transform_2, window_bounds = array<i64: 8, 256>}]} {
    %c0 = arith.constant 0 : index
    %c0_0 = arith.constant 0 : index
    %0 = vector.load %arg1[%c0, %c0_0] : memref<8x256xf32, #tpu.memory_space<vmem>>, vector<8x256xf32>
    %c0_1 = arith.constant 0 : index
    %c0_2 = arith.constant 0 : index
    %1 = vector.load %arg2[%c0_1, %c0_2] : memref<8x2xf32, #tpu.memory_space<vmem>>, vector<8x1xf32>
    %c0_3 = arith.constant 0 : index
    %c1 = arith.constant 1 : index
    %2 = vector.load %arg2[%c0_3, %c1] : memref<8x2xf32, #tpu.memory_space<vmem>>, vector<8x1xf32>
    %cst = arith.constant dense<0.000000e+00> : vector<8xf32>
    %3 = vector.multi_reduction <add>, %0, %cst [1] : vector<8x256xf32> to vector<8xf32>
    %4 = vector.shape_cast %3 : vector<8xf32> to vector<8x1xf32>
    %cst_4 = arith.constant 3.906250e-03 : f32
    %5 = vector.broadcast %cst_4 : f32 to vector<8x1xf32>
    %6 = arith.mulf %4, %5 : vector<8x1xf32>
    %7 = vector.broadcast %6 : vector<8x1xf32> to vector<8x256xf32>
    %8 = arith.subf %0, %7 : vector<8x256xf32>
    %9 = arith.mulf %8, %8 : vector<8x256xf32>
    %cst_5 = arith.constant dense<0.000000e+00> : vector<8xf32>
    %10 = vector.multi_reduction <add>, %9, %cst_5 [1] : vector<8x256xf32> to vector<8xf32>
    %11 = vector.shape_cast %10 : vector<8xf32> to vector<8x1xf32>
    %cst_6 = arith.constant 3.906250e-03 : f32
    %12 = vector.broadcast %cst_6 : f32 to vector<8x1xf32>
    %13 = arith.mulf %11, %12 : vector<8x1xf32>
    %14 = math.rsqrt %13 : vector<8x1xf32>
    %15 = arith.mulf %14, %1 : vector<8x1xf32>
    %16 = arith.subf %2, %15 : vector<8x1xf32>
    %17 = vector.broadcast %1 : vector<8x1xf32> to vector<8x256xf32>
    %18 = arith.mulf %8, %17 : vector<8x256xf32>
    %19 = vector.broadcast %16 : vector<8x1xf32> to vector<8x256xf32>
    %20 = arith.addf %18, %19 : vector<8x256xf32>
    %c0_7 = arith.constant 0 : index
    %c0_8 = arith.constant 0 : index
    %21 = vector.load %arg3[%c0_7, %c0_8] : memref<8x256xf32, #tpu.memory_space<vmem>>, vector<8x256xf32>
    tpu.vector_store %arg3[%c0_7, %c0_8], %20 {strides = array<i32>} : memref<8x256xf32, #tpu.memory_space<vmem>>, vector<8x256xf32>,
    return
  }
  func.func @transform_0(%arg0: i32) -> (i32, i32) {
    %c0_i32 = arith.constant 0 : i32
    %c0_i32_0 = arith.constant 0 : i32
    return %arg0, %c0_i32 : i32, i32
  }
  func.func @transform_1(%arg0: i32) -> (i32, i32) {
    %c0_i32 = arith.constant 0 : i32
    %c0_i32_0 = arith.constant 0 : i32
    return %arg0, %c0_i32 : i32, i32
  }
  func.func @transform_2(%arg0: i32) -> (i32, i32) {
    %c0_i32 = arith.constant 0 : i32
    %c0_i32_0 = arith.constant 0 : i32
    return %arg0, %c0_i32 : i32, i32
  }
}

</mosaic_0001>

<bundles_post_ra>
// kernel: adain_forward.1
= control target key start
LH: loop header
LB: loop body
LE: loop exit
PB: predicated region body
PF: predicated region fallthrough
CT: control target
= control target key end

     0   :  { %v60_v10 = vmov 0   ;;  %v61_v13 = vmov 1   ;;  %s93_s0 = inlined_call_operand.vmem [shape: f32[8,256], index: 0, kind: input, shape index: {}]   ;;  %s94_s1 = inlined_call_operand.vmem [shape: f32[8,2], index: 1, kind: input, shape index: {}]   ;;  %s95_s2 = inlined_call_operand.vmem [shape: f32[8,256], index: 2, kind: output, shape index: {}]  }
   0x1   :  { %v11_v0 = vld [vmem:[%s93_s0] sm:$0xff]  ;;  %v12_v1 = vld [vmem:[%s93_s0 + $0x8] sm:$0xff]  ;;  %56 = vset.pattern.permute.xlu1 %v60_v10  ;;  %57 = vset.pattern.permute.xlu0 %v61_v13  ;;  %s62_s0 = smov 1  }
   0x2   :  { %v14_v2 = vadd.f32 %v12_v1, %v11_v0  ;;  %v13_v14 = vld [vmem:[%s94_s1] sm:$0xff] }
   0x4   :  { %15 = vadd.xlane.f32.xlu0 %v14_v2 }
  0x91   :  { %v16_v3 = vpop.xlane.xlu0 %15 }
  0x92   :  { %v17_v4 = vmul.f32 0.00390625, %v16_v3 }
  0x94   :  { %v18_v5 = vsub.f32 %v11_v0, %v17_v4  ;;  %v19_v6 = vsub.f32 %v12_v1, %v17_v4 }
  0x96   :  { %v20_v7 = vmul.f32 %v18_v5, %v18_v5  ;;  %v21_v8 = vmul.f32 %v19_v6, %v19_v6 }
  0x98   :  { %v22_v9 = vadd.f32 %v21_v8, %v20_v7 }
  0x9a   :  { %23 = vadd.xlane.f32.xlu0 %v22_v9 }
 0x127   :  { %v24_v11 = vpop.xlane.xlu0 %23 }
 0x128   :  { %v25_v12 = vmul.f32 0.00390625, %v24_v11 }
 0x12a   :  { %58 = vrsqrt.f32 %v25_v12 }
 0x134   :  { %v59_v15 = vpop.eup %58 }
 0x135   :  { %v27_v16 = vmul.f32 %v59_v15, %v13_v14 }
 0x137   :  { %29 = vrot.lane.b32.xlu1 %v27_v16, %s62_s0 }
 0x13b   :  { %35 = vperm.xlu1 %56, %v13_v14  }
 0x1a9   :  { %v30_v17 = vpop.permute.xlu1 %29 }
 0x1aa   :  { %v32_v18 = vsub.f32 %v13_v14, %v30_v17 }
 0x1ac   :  { %42 = vperm.xlu0 %57, %v32_v18  }
 0x1ba   :  { %v36_v19 = vpop.permute.xlu1 %35 }
 0x1bb   :  { %v38_v20 = vmul.f32 %v36_v19, %v18_v5  ;;  %v39_v21 = vmul.f32 %v36_v19, %v19_v6 }
 0x22b   :  { %v43_v22 = vpop.permute.xlu0 %42 }
 0x22c   :  { %v45_v23 = vadd.f32 %v43_v22, %v38_v20  ;;  %v46_v24 = vadd.f32 %v43_v22, %v39_v21 }
 0x22e   :  { %47 = vst [vmem:[%s95_s2] sm:$0xff] %v45_v23  ;;  %48 = vst [vmem:[%s95_s2 + $0x8] sm:$0xff] %v46_v24 }

</bundles_post_ra>
